<compile_context>
chip_gen: v6e
topology: v6e:2x2x1
jax: 0.10.0
libtpu: 0.0.40
codegen_flags: <defaults>
</compile_context>

<pallas_src>
import functools
import math

import jax
import jax.numpy as jnp
from jax.experimental import pallas as pl
from jax.experimental.pallas import tpu as pltpu


# ---------------------------------------------------------------------------
# Row/column-tiled Linear:  o = x @ w + b
# ---------------------------------------------------------------------------
def _linear_kernel(x_ref, w_ref, b_ref, o_ref):
    # x_ref: (TM, C)  w_ref: (C, TN)  b_ref: (1, TN)  o_ref: (TM, TN)
    acc = jnp.dot(x_ref[...], w_ref[...], preferred_element_type=jnp.float32)
    o_ref[...] = (acc + b_ref[...].astype(jnp.float32)).astype(o_ref.dtype)


def linear_pallas(x, w, b, *, row_tile=512, col_tile=1536):
    """x: (M, C), w: (C, N), b: (N,) -> (M, N)."""
    M, C = x.shape
    Cw, N = w.shape
    assert C == Cw, (C, Cw)
    b2 = b.reshape(1, N)
    itemsize = x.dtype.itemsize

    tm = M if M <= row_tile else row_tile
    # Tile the output columns only when N is large (keeps the resident weight
    # tile + double-buffered activation/output tiles under v7x's 64 MiB VMEM).
    if N <= col_tile or N % 128 != 0:
        tn = N
    else:
        tn = col_tile

    grid = (pl.cdiv(M, tm), pl.cdiv(N, tn))
    # Double-buffered activation / output / weight / bias tiles + headroom.
    footprint = 2 * (tm * C + tm * tn + C * tn + tn) * itemsize
    vmem_limit = int(min(footprint + (16 << 20), 64 << 20))

    return pl.pallas_call(
        _linear_kernel,
        out_shape=jax.ShapeDtypeStruct((M, N), x.dtype),
        grid=grid,
        in_specs=[
            pl.BlockSpec((tm, C), lambda i, j: (i, 0)),   # activation row tile
            pl.BlockSpec((C, tn), lambda i, j: (0, j)),   # weight column tile
            pl.BlockSpec((1, tn), lambda i, j: (0, j)),   # bias column tile
        ],
        out_specs=pl.BlockSpec((tm, tn), lambda i, j: (i, j)),
        compiler_params=pltpu.CompilerParams(
            dimension_semantics=("parallel", "parallel"),
            vmem_limit_bytes=vmem_limit,
        ),
    )(x, w, b2)


# ---------------------------------------------------------------------------
# Fused attention: all heads of G (b*t) slices per grid step, lane-dense output.
# ---------------------------------------------------------------------------
def _attn_kernel(q_ref, k_ref, v_ref, o_ref, *, scale, num_heads):
    # q_ref / k_ref / v_ref / o_ref: (G, K, C) with C = num_heads * head_dim.
    G, K, C = q_ref.shape
    hd = C // num_heads
    # Fold the softmax scale into q once (G*K*C mults) instead of scaling the
    # (K, K) score matrices per head.  Keep the native MXU operand dtype.
    q = (q_ref[...] * scale).astype(q_ref.dtype)
    k = k_ref[...]
    v = v_ref[...]

    outs = []
    for h in range(num_heads):               # static loop over heads
        sl = slice(h * hd, (h + 1) * hd)
        q_h, k_h, v_h = q[..., sl], k[..., sl], v[..., sl]
        s = jnp.einsum("gqd,gkd->gqk", q_h, k_h,
                       preferred_element_type=jnp.float32)          # (G, K, K)
        s = s - jnp.max(s, axis=-1, keepdims=True)
        p = jnp.exp(s)
        inv = pl.reciprocal(jnp.sum(p, axis=-1, keepdims=True), approx=True)
        p = (p * inv).astype(v.dtype)
        outs.append(jnp.einsum("gqk,gkd->gqd", p, v_h,
                               preferred_element_type=jnp.float32))  # (G, K, hd)
    # Heads merged along the lane axis -> one lane-dense (G, K, C) store.
    o_ref[...] = jnp.concatenate(outs, axis=-1).astype(o_ref.dtype)


def multi_head_attention_pallas(qkv, num_heads, scale, *, max_group=8,
                                group_bytes=4 << 20):
    """qkv: (BT, K, 3*C) laid out as (qkv, head, head_dim) along the last axis.

    Returns (BT, K, C) with heads already merged (head-major along the last axis).
    """
    BT, K, threeC = qkv.shape
    C = threeC // 3
    itemsize = qkv.dtype.itemsize

    # Group G (b*t) slices per grid step to amortize the ~0.35us/step overhead,
    # capped by a VMEM budget; keep >= a few grid steps for v7x's 2 TensorCores.
    cap = max(1, min(max_group, group_bytes // max(1, 4 * K * C * itemsize)))
    if BT >= 8:
        cap = min(cap, max(1, BT // 4))
    G = 1
    for d in range(1, BT + 1):
        if BT % d == 0 and d <= cap:
            G = d

    kernel = functools.partial(_attn_kernel, scale=scale, num_heads=num_heads)
    vmem_limit = int(min(8 * G * K * C * itemsize + 2 * G * K * K * 4
                         + (16 << 20), 64 << 20))
    compiler_params = pltpu.CompilerParams(
        dimension_semantics=("parallel",), vmem_limit_bytes=vmem_limit)
    out_shape = jax.ShapeDtypeStruct((BT, K, C), qkv.dtype)
    out_spec = pl.BlockSpec((G, K, C), lambda i: (i, 0, 0))

    if C % 128 == 0:
        # Fused path: slice q / k / v straight out of the (BT, K, 3C) qkv tensor
        # with lane-block index maps -- no XLA transpose / copy of qkv.
        in_specs = [
            pl.BlockSpec((G, K, C), lambda i: (i, 0, 0)),   # q columns [0, C)
            pl.BlockSpec((G, K, C), lambda i: (i, 0, 1)),   # k columns [C, 2C)
            pl.BlockSpec((G, K, C), lambda i: (i, 0, 2)),   # v columns [2C, 3C)
        ]
        operands = (qkv, qkv, qkv)
    else:
        # C not lane-aligned: pre-slice q/k/v with XLA (contiguous copies, still
        # no transposes); full-extent blocks are always layout-legal.
        q = jax.lax.slice_in_dim(qkv, 0, C, axis=2)
        k = jax.lax.slice_in_dim(qkv, C, 2 * C, axis=2)
        v = jax.lax.slice_in_dim(qkv, 2 * C, 3 * C, axis=2)
        spec = pl.BlockSpec((G, K, C), lambda i: (i, 0, 0))
        in_specs = [spec, spec, spec]
        operands = (q, k, v)

    return pl.pallas_call(
        kernel,
        out_shape=out_shape,
        grid=(BT // G,),
        in_specs=in_specs,
        out_specs=out_spec,
        compiler_params=compiler_params,
    )(*operands)


# ---------------------------------------------------------------------------
# Module
# ---------------------------------------------------------------------------
class AttentionSpatial:
    """JAX/Pallas port of TimeSformer's Attention_Spatial (forward only)."""

    def __init__(self, dim, num_heads=8, qkv_bias=False, qk_scale=None,
                 attn_drop=0.0, proj_drop=0.0, with_qkv=True, *,
                 key, dtype=jnp.float32):
        assert with_qkv, "with_qkv=False path not supported (see TODO above)"
        assert dim % num_heads == 0
        self.num_heads = num_heads
        head_dim = dim // num_heads
        self.scale = qk_scale or head_dim ** (-0.5)
        self.with_qkv = with_qkv
        self.attn_drop = attn_drop
        self.proj_drop = proj_drop

        k1, k2, k3, k4 = jax.random.split(key, 4)
        lim = 1.0 / math.sqrt(dim)
        # Weights stored already transposed: (in_features, out_features).
        self.w_qkv = jax.random.uniform(k1, (dim, 3 * dim), dtype, -lim, lim)
        self.b_qkv = (jax.random.uniform(k2, (3 * dim,), dtype, -lim, lim)
                      if qkv_bias else jnp.zeros((3 * dim,), dtype))
        self.w_proj = jax.random.uniform(k3, (dim, dim), dtype, -lim, lim)
        self.b_proj = jax.random.uniform(k4, (dim,), dtype, -lim, lim)

    def __call__(self, x, B):
        BT, K, C = x.shape
        del B  # (b t) stays fused through the whole computation

        # QKV projection (Pallas matmul kernel).
        qkv = linear_pallas(x.reshape(BT * K, C), self.w_qkv, self.b_qkv)
        qkv = qkv.reshape(BT, K, 3 * C)                     # free reshape

        # Fused multi-head attention (Pallas kernel); head split/merge handled by
        # BlockSpec index maps, attn_drop = identity.  Output already (BT, K, C).
        o = multi_head_attention_pallas(qkv, self.num_heads, self.scale)

        # Output projection (Pallas matmul kernel), proj_drop = identity.
        y = linear_pallas(o.reshape(BT * K, C), self.w_proj, self.b_proj)
        return y.reshape(BT, K, C)


# ---------------------------------------------------------------------------
# Pure-JAX reference (for the sanity check)
# ---------------------------------------------------------------------------
def attention_spatial_ref(x, w_qkv, b_qkv, w_proj, b_proj, num_heads, scale):
    BT, K, C = x.shape
    hd = C // num_heads
    hp = jax.lax.Precision.HIGHEST
    qkv = jnp.einsum("bkc,cn->bkn", x, w_qkv, precision=hp) + b_qkv
    qkv = qkv.reshape(BT, K, 3, num_heads, hd).transpose(2, 0, 3, 1, 4)
    q, k, v = qkv[0], qkv[1], qkv[2]
    s = jnp.einsum("bhqd,bhkd->bhqk", q, k, precision=hp) * scale
    p = jax.nn.softmax(s, axis=-1)
    o = jnp.einsum("bhqk,bhkd->bhqd", p, v, precision=hp)
    o = o.transpose(0, 2, 1, 3).reshape(BT, K, C)
    return jnp.einsum("bkc,cd->bkd", o, w_proj, precision=hp) + b_proj


if __name__ == "__main__":
    key = jax.random.PRNGKey(0)
    kparam, kx = jax.random.split(key)

    # Small TimeSformer-like shapes: B=2 videos, T=2 frames, K=16 spatial tokens,
    # C=128 hidden (lane-aligned), 4 heads (head_dim=32).
    B, T, K, C, H = 2, 2, 16, 128, 4
    BT = B * T
    x = jax.random.normal(kx, (BT, K, C), dtype=jnp.float32)

    module = AttentionSpatial(dim=C, num_heads=H, qkv_bias=True, key=kparam)

    out = jax.block_until_ready(module(x, B))

    ref = attention_spatial_ref(
        x, module.w_qkv, module.b_qkv, module.w_proj, module.b_proj,
        H, module.scale,
    )

    assert out.shape == (BT, K, C) and out.dtype == x.dtype
    assert bool(jnp.all(jnp.isfinite(out)))
    max_err = float(jnp.max(jnp.abs(out - ref)))
    assert jnp.allclose(out, ref, atol=2e-2, rtol=2e-2), f"max abs err {max_err}"

    print("KERNEL_OK")
</pallas_src>

<mosaic_0001>
module attributes {stable_mosaic.version = 11 : i64} {
  func.func @_linear_kernel(%arg0: i32, %arg1: i32, %arg2: memref<64x128xf32, #tpu.memory_space<vmem>>, %arg3: memref<128x384xf32, #tpu.memory_space<vmem>>, %arg4: memref<1x384xf32, #tpu.memory_space<vmem>>, %arg5: memref<64x384xf32, #tpu.memory_space<vmem>>) attributes {dimension_semantics = [#tpu.dimension_semantics<parallel>, #tpu.dimension_semantics<parallel>], iteration_bounds = array<i64: 1, 1>, scalar_prefetch = 0 : i64, scratch_operands = 0 : i64, tpu.core_type = #tpu.core_type<tc>, window_params = [{transform_indices = @transform_0, window_bounds = array<i64: 64, 128>}, {transform_indices = @transform_1, window_bounds = array<i64: 128, 384>}, {transform_indices = @transform_2, window_bounds = array<i64: 1, 384>}, {transform_indices = @transform_3, window_bounds = array<i64: 64, 384>}]} {
    %c0 = arith.constant 0 : index
    %c0_0 = arith.constant 0 : index
    %0 = vector.load %arg2[%c0, %c0_0] : memref<64x128xf32, #tpu.memory_space<vmem>>, vector<64x128xf32>
    %c0_1 = arith.constant 0 : index
    %c0_2 = arith.constant 0 : index
    %1 = vector.load %arg3[%c0_1, %c0_2] : memref<128x384xf32, #tpu.memory_space<vmem>>, vector<128x384xf32>
    %cst = arith.constant dense<0.000000e+00> : vector<64x384xf32>
    %2 = tpu.matmul %0, %1, %cst {dimension_numbers = #tpu.dot_dimension_numbers<[1], [0], [0], [1], [0, 0, 1, 1], [], []>} : vector<64x128xf32>, vector<128x384xf32>, vector<64x384xf32> -> vector<64x384xf32>
    %c0_3 = arith.constant 0 : index
    %c0_4 = arith.constant 0 : index
    %3 = vector.load %arg4[%c0_3, %c0_4] : memref<1x384xf32, #tpu.memory_space<vmem>>, vector<1x384xf32>
    %4 = vector.broadcast %3 : vector<1x384xf32> to vector<64x384xf32>
    %5 = arith.addf %2, %4 : vector<64x384xf32>
    %c0_5 = arith.constant 0 : index
    %c0_6 = arith.constant 0 : index
    %6 = vector.load %arg5[%c0_5, %c0_6] : memref<64x384xf32, #tpu.memory_space<vmem>>, vector<64x384xf32>
    tpu.vector_store %arg5[%c0_5, %c0_6], %5 {strides = array<i32>} : memref<64x384xf32, #tpu.memory_space<vmem>>, vector<64x384xf32>,
    return
  }
  func.func @transform_0(%arg0: i32, %arg1: i32) -> (i32, i32) {
    %c0_i32 = arith.constant 0 : i32
    %c0_i32_0 = arith.constant 0 : i32
    return %arg0, %c0_i32 : i32, i32
  }
  func.func @transform_1(%arg0: i32, %arg1: i32) -> (i32, i32) {
    %c0_i32 = arith.constant 0 : i32
    %c0_i32_0 = arith.constant 0 : i32
    return %c0_i32, %arg1 : i32, i32
  }
  func.func @transform_2(%arg0: i32, %arg1: i32) -> (i32, i32) {
    %c0_i32 = arith.constant 0 : i32
    %c0_i32_0 = arith.constant 0 : i32
    return %c0_i32, %arg1 : i32, i32
  }
  func.func @transform_3(%arg0: i32, %arg1: i32) -> (i32, i32) {
    %c0_i32 = arith.constant 0 : i32
    return %arg0, %arg1 : i32, i32
  }
}

</mosaic_0001>

<bundles_post_ra>
// kernel: tpu_custom_call.1
= control target key start
LH: loop header
LB: loop body
LE: loop exit
PB: predicated region body
PF: predicated region fallthrough
CT: control target
= control target key end

     0   :  { %8 = vsyncpa [#allocation3], 0  ;;  %s592_s0 = inlined_call_operand.hbm [shape: f32[64,128], index: 0, kind: input, shape index: {}]   ;;  %s593_s1 = inlined_call_operand.hbm [shape: f32[128,384], index: 1, kind: input, shape index: {}]   ;;  %s594_s2 = inlined_call_operand.vmem [shape: f32[1,384], index: 2, kind: input, shape index: {}]   ;;  %s595_s3 = inlined_call_operand.hbm [shape: f32[64,384], index: 3, kind: output, shape index: {}]  }
   0x1   :  { %9 = vsyncpa [#allocation6], 0 }
   0x2   :  { %10 = vsyncpa [#allocation4], 0  ;;  %s518_s12 = smov [#allocation2]  }
   0x3   :  { %s16_s13 = sshll.u32 %s518_s12, 4  ;;  %s17_s13 = int_to_ptr.vmem [resolvable:$true] %s16_s13 }
   0x4   :  { %s460_s14 = scalar_lea.vmem %s17_s13, 1024  ;;  %p465_p1 = scmp.lt.s32.totalorder %s17_s13, %s17_s13 }
   0x5   :  { %p461_p0 = scmp.ne.s32.totalorder %s17_s13, %s460_s14  ;;  %p466_p2 = scmp.lt.s32.totalorder %s460_s14, %s460_s14 }
   0x7   :  { %p467_p3 = por %p466_p2, %p465_p1 }
   0x9   :  { %p468_p4 = pnand %p467_p3, %p461_p0 }
   0xb   :  { %471 = shalt.err (!%p468_p4)
}
   0xc   :  { %s519_s15 = smov 128   ;;  %s520_s16 = smov 8  }
   0xd   :  { %22 = dma.hbm_to_vmem [thread:$0]  %s592_s0, 1024, %s17_s13, [#allocation3], %s519_s15, %s519_s15, %s520_s16  }
   0xe   :  { %s521_s19 = smov [#allocation5]  }
   0xf   :  { %s28_s20 = sshll.u32 %s521_s19, 4  ;;  %s29_s20 = int_to_ptr.vmem [resolvable:$true] %s28_s20 }
  0x10   :  { %s480_s21 = scalar_lea.vmem %s29_s20, 6144  ;;  %p485_p6 = scmp.lt.s32.totalorder %s29_s20, %s29_s20 }
  0x11   :  { %p481_p5 = scmp.ne.s32.totalorder %s29_s20, %s480_s21  ;;  %p486_p7 = scmp.lt.s32.totalorder %s480_s21, %s480_s21 }
  0x13   :  { %p487_p8 = por %p486_p7, %p485_p6 }
  0x15   :  { %p488_p9 = pnand %p487_p8, %p481_p5 }
  0x17   :  { %491 = shalt.err (!%p488_p9)
}
  0x18   :  { %s522_s22 = smov 384   ;;  %s523_s23 = smov 24  }
  0x19   :  { %34 = dma.hbm_to_vmem [thread:$0]  %s593_s1, 6144, %s29_s20, [#allocation6], %s522_s22, %s522_s22, %s523_s23  }
  0x1a   :  { %512 = dma.done.wait [#allocation3], 1024  }
  0x1b   :  { %513 = vsyncadd [#allocation3], 4294966272 }
  0x1c   :  { %514 = dma.done.wait [#allocation6], 6144  }
  0x1d   :  { %515 = vsyncadd [#allocation6], 4294961152  ;;  %v524_v0 = vmov 0.0   ;;  %v97_v1 = vld [vmem:[#allocation5 + $0x170] sm:$0xff]  ;;  %v96_v2 = vld [vmem:[#allocation5 + $0x168] sm:$0xff]  ;;  %v101_v57 = vlaneseq }
  0x1e   :  { %180 = vmatprep.mubr.f32.mxu0 %v524_v0  ;;  %v94_v3 = vld [vmem:[#allocation5 + $0x158] sm:$0xff]  ;;  %116 = vmatprep.subr.mxu0 %v97_v1  ;;  %v93_v4 = vld [vmem:[#allocation5 + $0x150] sm:$0xff]  ;;  %v91_v5 = vld [vmem:[#allocation5 + $0x140] sm:$0xff] }
  0x1f   :  { %117 = vmatpush1.msra.mxu0 %v96_v2  ;;  %v90_v6 = vld [vmem:[#allocation5 + $0x138] sm:$0xff]  ;;  %v88_v7 = vld [vmem:[#allocation5 + $0x128] sm:$0xff]  ;;  %v87_v8 = vld [vmem:[#allocation5 + $0x120] sm:$0xff]  ;;  %v102_v58 = vshrl.u32 %v101_v57, 7 }
  0x20   :  { %118 = vmatprep.subr.mxu0 %v94_v3  ;;  %v98_v9 = vld [vmem:[#allocation5 + $0x178] sm:$0xff]  ;;  %v85_v10 = vld [vmem:[#allocation5 + $0x110] sm:$0xff]  ;;  %v95_v11 = vld [vmem:[#allocation5 + $0x160] sm:$0xff] }
  0x21   :  { %119 = vmatpush1.msra.mxu0 %v93_v4  ;;  %400 = vmatprep.subr.mxu1 %v98_v9  ;;  %v84_v12 = vld [vmem:[#allocation5 + $0x108] sm:$0xff]  ;;  %v82_v14 = vld [vmem:[#allocation5 + $0xf8] sm:$0xff]  ;;  %v81_v15 = vld [vmem:[#allocation5 + $0xf0] sm:$0xff]  ;;  %v103_v59 = vsub.s32 0, %v102_v58  ;;  %v107_v61 = vsub.s32 1, %v102_v58  ;;  %v111_v63 = vsub.s32 2, %v102_v58 }
  0x22   :  { %120 = vmatprep.subr.mxu0 %v91_v5  ;;  %401 = vmatpush3.msra.mxu1 %v98_v9  ;;  %v92_v13 = vld [vmem:[#allocation5 + $0x148] sm:$0xff]  ;;  %v89_v16 = vld [vmem:[#allocation5 + $0x130] sm:$0xff]  ;;  %v79_v17 = vld [vmem:[#allocation5 + $0xe0] sm:$0xff] }
  0x23   :  { %121 = vmatpush1.msra.mxu0 %v90_v6  ;;  %402 = vmatprep.subr.mxu1 %v95_v11  ;;  %v78_v18 = vld [vmem:[#allocation5 + $0xd8] sm:$0xff]  ;;  %v76_v20 = vld [vmem:[#allocation5 + $0xc8] sm:$0xff]  ;;  %v75_v21 = vld [vmem:[#allocation5 + $0xc0] sm:$0xff] }
  0x24   :  { %122 = vmatprep.subr.mxu0 %v88_v7  ;;  %403 = vmatpush3.msra.mxu1 %v95_v11  ;;  %v86_v19 = vld [vmem:[#allocation5 + $0x118] sm:$0xff]  ;;  %v83_v22 = vld [vmem:[#allocation5 + $0x100] sm:$0xff]  ;;  %v73_v23 = vld [vmem:[#allocation5 + $0xb0] sm:$0xff] }
  0x25   :  { %123 = vmatpush1.msra.mxu0 %v87_v8  ;;  %404 = vmatprep.subr.mxu1 %v92_v13  ;;  %v72_v24 = vld [vmem:[#allocation5 + $0xa8] sm:$0xff]  ;;  %v70_v26 = vld [vmem:[#allocation5 + $0x98] sm:$0xff]  ;;  %v69_v27 = vld [vmem:[#allocation5 + $0x90] sm:$0xff] }
  0x26   :  { %124 = vmatprep.subr.mxu0 %v85_v10  ;;  %405 = vmatpush3.msra.mxu1 %v92_v13  ;;  %v80_v25 = vld [vmem:[#allocation5 + $0xe8] sm:$0xff]  ;;  %v77_v28 = vld [vmem:[#allocation5 + $0xd0] sm:$0xff]  ;;  %v67_v29 = vld [vmem:[#allocation5 + $0x80] sm:$0xff] }
  0x27   :  { %125 = vmatpush1.msra.mxu0 %v84_v12  ;;  %406 = vmatprep.subr.mxu1 %v89_v16  ;;  %v66_v30 = vld [vmem:[#allocation5 + $0x78] sm:$0xff]  ;;  %v64_v32 = vld [vmem:[#allocation5 + $0x68] sm:$0xff]  ;;  %v63_v33 = vld [vmem:[#allocation5 + $0x60] sm:$0xff] }
  0x28   :  { %126 = vmatprep.subr.mxu0 %v82_v14  ;;  %407 = vmatpush3.msra.mxu1 %v89_v16  ;;  %v74_v31 = vld [vmem:[#allocation5 + $0xb8] sm:$0xff]  ;;  %v71_v34 = vld [vmem:[#allocation5 + $0xa0] sm:$0xff]  ;;  %v61_v35 = vld [vmem:[#allocation5 + $0x50] sm:$0xff] }
  0x29   :  { %127 = vmatpush1.msra.mxu0 %v81_v15  ;;  %408 = vmatprep.subr.mxu1 %v86_v19  ;;  %v60_v36 = vld [vmem:[#allocation5 + $0x48] sm:$0xff]  ;;  %v58_v38 = vld [vmem:[#allocation5 + $0x38] sm:$0xff]  ;;  %v57_v39 = vld [vmem:[#allocation5 + $0x30] sm:$0xff] }
  0x2a   :  { %128 = vmatprep.subr.mxu0 %v79_v17  ;;  %409 = vmatpush3.msra.mxu1 %v86_v19  ;;  %v68_v37 = vld [vmem:[#allocation5 + $0x88] sm:$0xff]  ;;  %v65_v40 = vld [vmem:[#allocation5 + $0x70] sm:$0xff]  ;;  %v55_v41 = vld [vmem:[#allocation5 + $0x20] sm:$0xff] }
  0x2b   :  { %129 = vmatpush1.msra.mxu0 %v78_v18  ;;  %410 = vmatprep.subr.mxu1 %v83_v22  ;;  %v54_v42 = vld [vmem:[#allocation5 + $0x18] sm:$0xff]  ;;  %v52_v44 = vld [vmem:[#allocation5 + $0x8] sm:$0xff]  ;;  %v51_v45 = vld [vmem:[#allocation5] sm:$0xff] }
  0x2c   :  { %130 = vmatprep.subr.mxu0 %v76_v20  ;;  %411 = vmatpush3.msra.mxu1 %v83_v22  ;;  %v62_v43 = vld [vmem:[#allocation5 + $0x58] sm:$0xff]  ;;  %v59_v46 = vld [vmem:[#allocation5 + $0x40] sm:$0xff]  ;;  %v56_v48 = vld [vmem:[#allocation5 + $0x28] sm:$0xff] }
  0x2d   :  { %131 = vmatpush1.msra.mxu0 %v75_v21  ;;  %412 = vmatprep.subr.mxu1 %v80_v25  ;;  %v43_v47 = vld [vmem:[#allocation2] sm:$0xff]  ;;  %v53_v49 = vld [vmem:[#allocation5 + $0x10] sm:$0xff]  ;;  %v44_v50 = vld [vmem:[#allocation2 + $0x8] sm:$0xff] }
  0x2e   :  { %132 = vmatprep.subr.mxu0 %v73_v23  ;;  %413 = vmatpush3.msra.mxu1 %v80_v25  ;;  %v45_v51 = vld [vmem:[#allocation2 + $0x10] sm:$0xff]  ;;  %v46_v52 = vld [vmem:[#allocation2 + $0x18] sm:$0xff]  ;;  %v47_v53 = vld [vmem:[#allocation2 + $0x20] sm:$0xff] }
  0x2f   :  { %133 = vmatpush1.msra.mxu0 %v72_v24  ;;  %414 = vmatprep.subr.mxu1 %v77_v28  ;;  %v49_v54 = vld [vmem:[#allocation2 + $0x30] sm:$0xff]  ;;  %v48_v55 = vld [vmem:[#allocation2 + $0x28] sm:$0xff]  ;;  %v50_v56 = vld [vmem:[#allocation2 + $0x38] sm:$0xff] }
  0x30   :  { %134 = vmatprep.subr.mxu0 %v70_v26  ;;  %415 = vmatpush3.msra.mxu1 %v77_v28  ;;  %v99_v60 = vld [vmem:[%s594_s2] sm:$0x7]  ;;  %s525_s2 = smov [#allocation7]  }
  0x31   :  { %135 = vmatpush1.msra.mxu0 %v69_v27  ;;  %416 = vmatprep.subr.mxu1 %v74_v31  ;;  %v566_v62 = vrot.slane %v99_v60, %v103_v59  ;;  %v568_v1 = vrot.slane %v99_v60, %v107_v61  ;;  %v112_v5 = vrot.slane %v99_v60, %v111_v63  ;;  %s363_s26 = sshll.u32 %s525_s2, 4  ;;  %s364_s26 = int_to_ptr.vmem [resolvable:$true] %s363_s26 }
  0x32   :  { %136 = vmatprep.subr.mxu0 %v67_v29  ;;  %417 = vmatpush3.msra.mxu1 %v74_v31  ;;  %s492_s27 = scalar_lea.vmem %s364_s26, 3072  ;;  %p497_p11 = scmp.lt.s32.totalorder %s364_s26, %s364_s26 }
  0x33   :  { %137 = vmatpush1.msra.mxu0 %v66_v30  ;;  %418 = vmatprep.subr.mxu1 %v71_v34  ;;  %p493_p10 = scmp.ne.s32.totalorder %s364_s26, %s492_s27  ;;  %p498_p12 = scmp.lt.s32.totalorder %s492_s27, %s492_s27 }
  0x34   :  { %138 = vmatprep.subr.mxu0 %v64_v32  ;;  %419 = vmatpush3.msra.mxu1 %v71_v34 }
  0x35   :  { %139 = vmatpush1.msra.mxu0 %v63_v33  ;;  %420 = vmatprep.subr.mxu1 %v68_v37  ;;  %p499_p13 = por %p498_p12, %p497_p11 }
  0x36   :  { %140 = vmatprep.subr.mxu0 %v61_v35  ;;  %421 = vmatpush3.msra.mxu1 %v68_v37 }
  0x37   :  { %141 = vmatpush1.msra.mxu0 %v60_v36  ;;  %422 = vmatprep.subr.mxu1 %v65_v40  ;;  %p500_p0 = pnand %p499_p13, %p493_p10 }
  0x38   :  { %142 = vmatprep.subr.mxu0 %v58_v38  ;;  %423 = vmatpush3.msra.mxu1 %v65_v40 }
  0x39   :  { %143 = vmatpush1.msra.mxu0 %v57_v39  ;;  %424 = vmatprep.subr.mxu1 %v62_v43 }
  0x3a   :  { %144 = vmatprep.subr.mxu0 %v55_v41  ;;  %425 = vmatpush3.msra.mxu1 %v62_v43 }
  0x3b   :  { %145 = vmatpush1.msra.mxu0 %v54_v42  ;;  %426 = vmatprep.subr.mxu1 %v59_v46 }
  0x3c   :  { %146 = vmatprep.subr.mxu0 %v52_v44  ;;  %427 = vmatpush3.msra.mxu1 %v59_v46 }
  0x3d   :  { %147 = vmatpush1.msra.mxu0 %v51_v45  ;;  %428 = vmatprep.subr.mxu1 %v56_v48 }
  0x3e   :  { %181 = vmatmul.mubr.f32.vlgmr.msra.gmra.mxu0 %v43_v47  ;;  %429 = vmatpush3.msra.mxu1 %v56_v48 }
  0x3f   :  { %186 = vmatprep.mubr.f32.mxu0 %v524_v0  ;;  %432 = vmatprep.mubr.f32.mxu1 %v43_v47 }
  0x40   :  { %430 = vmatprep.subr.mxu1 %v53_v49 }
  0x41   :  { %431 = vmatpush3.msra.mxu1 %v53_v49 }
  0x42   :  { %187 = vmatmul.mubr.f32.gmra.mxu0 %v44_v50  ;;  %433 = vmatmul.mubr.f32.vlgmr.msra.gmra.mxu1 %v44_v50 }
  0x43   :  { %192 = vmatprep.mubr.f32.mxu0 %v524_v0  ;;  %435 = vmatprep.mubr.f32.mxu1 %v45_v51 }
  0x46   :  { %193 = vmatmul.mubr.f32.gmra.mxu0 %v45_v51  ;;  %436 = vmatmul.mubr.f32.gmra.mxu1 %v46_v52 }
  0x47   :  { %198 = vmatprep.mubr.f32.mxu0 %v524_v0  ;;  %438 = vmatprep.mubr.f32.mxu1 %v47_v53 }
  0x4a   :  { %199 = vmatmul.mubr.f32.gmra.mxu0 %v46_v52  ;;  %439 = vmatmul.mubr.f32.gmra.mxu1 %v48_v55 }
  0x4b   :  { %204 = vmatprep.mubr.f32.mxu0 %v524_v0  ;;  %441 = vmatprep.mubr.f32.mxu1 %v49_v54 }
  0x4e   :  { %205 = vmatmul.mubr.f32.gmra.mxu0 %v47_v53  ;;  %442 = vmatmul.mubr.f32.gmra.mxu1 %v50_v56 }
  0x4f   :  { %210 = vmatprep.mubr.f32.mxu0 %v524_v0 }
  0x52   :  { %211 = vmatmul.mubr.f32.gmra.mxu0 %v48_v55 }
  0x53   :  { %216 = vmatprep.mubr.f32.mxu0 %v524_v0 }
  0x56   :  { %217 = vmatmul.mubr.f32.gmra.mxu0 %v49_v54 }
  0x57   :  { %222 = vmatprep.mubr.f32.mxu0 %v524_v0 }
  0x5a   :  { %223 = vmatmul.mubr.f32.gmra.mxu0 %v50_v56 }
  0xfe   :  { %v182_v2 = vpop.f32.mrf.mxu0 }
  0xff   :  { %v183_v3 = vadd.f32 %v182_v2, %v566_v62 }
 0x100   :  { %v184_v4 = vpop.f32.mrf.mxu0 }
 0x101   :  { %334 = vst [vmem:[#allocation7] sm:$0xff] %v183_v3  ;;  %v185_v0 = vadd.f32 %v184_v4, %v568_v1 }
 0x102   :  { %v188_v6 = vpop.f32.mrf.mxu0  ;;  %v434_v8 = vpop.f32.mrf.mxu1 }
 0x103   :  { %335 = vst [vmem:[#allocation7 + $0x8] sm:$0xff] %v185_v0  ;;  %v189_v7 = vadd.f32 %v188_v6, %v566_v62  ;;  %v301_v10 = vadd.f32 %v434_v8, %v112_v5 }
 0x104   :  { %v190_v9 = vpop.f32.mrf.mxu0  ;;  %v295_v12 = vpop.f32.mrf.mxu1 }
 0x105   :  { %337 = vst [vmem:[#allocation7 + $0x18] sm:$0xff] %v189_v7  ;;  %v191_v11 = vadd.f32 %v190_v9, %v568_v1  ;;  %339 = vst [vmem:[#allocation7 + $0x28] sm:$0xff] %v301_v10  ;;  %v296_v14 = vadd.f32 %v295_v12, %v112_v5 }
 0x106   :  { %v194_v13 = vpop.f32.mrf.mxu0  ;;  %v437_v16 = vpop.f32.mrf.mxu1 }
 0x107   :  { %338 = vst [vmem:[#allocation7 + $0x20] sm:$0xff] %v191_v11  ;;  %v195_v15 = vadd.f32 %v194_v13, %v566_v62  ;;  %336 = vst [vmem:[#allocation7 + $0x10] sm:$0xff] %v296_v14  ;;  %v311_v18 = vadd.f32 %v437_v16, %v112_v5 }
 0x108   :  { %v196_v17 = vpop.f32.mrf.mxu0  ;;  %v305_v20 = vpop.f32.mrf.mxu1 }
 0x109   :  { %340 = vst [vmem:[#allocation7 + $0x30] sm:$0xff] %v195_v15  ;;  %v197_v19 = vadd.f32 %v196_v17, %v568_v1  ;;  %345 = vst [vmem:[#allocation7 + $0x58] sm:$0xff] %v311_v18  ;;  %v306_v22 = vadd.f32 %v305_v20, %v112_v5 }
 0x10a   :  { %v200_v21 = vpop.f32.mrf.mxu0  ;;  %v440_v24 = vpop.f32.mrf.mxu1 }
 0x10b   :  { %341 = vst [vmem:[#allocation7 + $0x38] sm:$0xff] %v197_v19  ;;  %v201_v23 = vadd.f32 %v200_v21, %v566_v62  ;;  %342 = vst [vmem:[#allocation7 + $0x40] sm:$0xff] %v306_v22  ;;  %v321_v26 = vadd.f32 %v440_v24, %v112_v5 }
 0x10c   :  { %v202_v25 = vpop.f32.mrf.mxu0  ;;  %v315_v28 = vpop.f32.mrf.mxu1 }
 0x10d   :  { %343 = vst [vmem:[#allocation7 + $0x48] sm:$0xff] %v201_v23  ;;  %v203_v27 = vadd.f32 %v202_v25, %v568_v1  ;;  %351 = vst [vmem:[#allocation7 + $0x88] sm:$0xff] %v321_v26  ;;  %v316_v30 = vadd.f32 %v315_v28, %v112_v5 }
 0x10e   :  { %v206_v29 = vpop.f32.mrf.mxu0  ;;  %v443_v32 = vpop.f32.mrf.mxu1 }
 0x10f   :  { %344 = vst [vmem:[#allocation7 + $0x50] sm:$0xff] %v203_v27  ;;  %v207_v31 = vadd.f32 %v206_v29, %v566_v62  ;;  %348 = vst [vmem:[#allocation7 + $0x70] sm:$0xff] %v316_v30  ;;  %v331_v34 = vadd.f32 %v443_v32, %v112_v5 }
 0x110   :  { %v208_v33 = vpop.f32.mrf.mxu0  ;;  %v325_v36 = vpop.f32.mrf.mxu1 }
 0x111   :  { %346 = vst [vmem:[#allocation7 + $0x60] sm:$0xff] %v207_v31  ;;  %v209_v35 = vadd.f32 %v208_v33, %v568_v1  ;;  %357 = vst [vmem:[#allocation7 + $0xb8] sm:$0xff] %v331_v34  ;;  %v326_v38 = vadd.f32 %v325_v36, %v112_v5 }
 0x112   :  { %v212_v37 = vpop.f32.mrf.mxu0 }
 0x113   :  { %347 = vst [vmem:[#allocation7 + $0x68] sm:$0xff] %v209_v35  ;;  %v213_v39 = vadd.f32 %v212_v37, %v566_v62  ;;  %354 = vst [vmem:[#allocation7 + $0xa0] sm:$0xff] %v326_v38 }
 0x114   :  { %v214_v40 = vpop.f32.mrf.mxu0 }
 0x115   :  { %349 = vst [vmem:[#allocation7 + $0x78] sm:$0xff] %v213_v39  ;;  %v215_v41 = vadd.f32 %v214_v40, %v568_v1 }
 0x116   :  { %v218_v42 = vpop.f32.mrf.mxu0 }
 0x117   :  { %350 = vst [vmem:[#allocation7 + $0x80] sm:$0xff] %v215_v41  ;;  %v219_v43 = vadd.f32 %v218_v42, %v566_v62 }
 0x118   :  { %v220_v44 = vpop.f32.mrf.mxu0 }
 0x119   :  { %352 = vst [vmem:[#allocation7 + $0x90] sm:$0xff] %v219_v43  ;;  %v221_v45 = vadd.f32 %v220_v44, %v568_v1 }
 0x11a   :  { %v224_v46 = vpop.f32.mrf.mxu0 }
 0x11b   :  { %353 = vst [vmem:[#allocation7 + $0x98] sm:$0xff] %v221_v45  ;;  %v225_v47 = vadd.f32 %v224_v46, %v566_v62 }
 0x11c   :  { %v226_v48 = vpop.f32.mrf.mxu0 }
 0x11d   :  { %355 = vst [vmem:[#allocation7 + $0xa8] sm:$0xff] %v225_v47  ;;  %v227_v49 = vadd.f32 %v226_v48, %v568_v1 }
 0x11f   :  { %356 = vst [vmem:[#allocation7 + $0xb0] sm:$0xff] %v227_v49 }
 0x120   :  { %503 = shalt.err (!%p500_p0)
}
 0x121   :  { %369 = dma.vmem_to_hbm [thread:$0]  %s364_s26, 3072, %s595_s3, [#allocation4], %s522_s22, %s522_s22, %s523_s23  }
 0x122   :  { %516 = dma.done.wait [#allocation4], 3072  }
 0x123   :  { %517 = vsyncadd [#allocation4], 4294964224 }
 0x124   :  { %373 = vsyncpa [#allocation3], 1 }
 0x125   :  { %374 = vsyncpa [#allocation6], 1 }
 0x126   :  { %375 = vsyncpa [#allocation4], 1 }

</bundles_post_ra>
